<compile_context>
chip_gen: v7x
topology: tpu7x:2x2x1
jax: 0.10.0
libtpu: 0.0.40
codegen_flags: <defaults>
</compile_context>

<pallas_src>
import functools

import jax
import jax.numpy as jnp
from jax.experimental import pallas as pl
from jax.experimental.pallas import tpu as pltpu


def _round_up(x, m):
    return ((x + m - 1) // m) * m


def _detect_tpu():
    """Best-effort generation detection for VMEM cap / megacore split."""
    try:
        kind = jax.devices()[0].device_kind.lower()
    except Exception:  # pragma: no cover - defensive
        kind = ""
    is_v7 = "v7" in kind
    if is_v7 or ("v5" not in kind and "v6" not in kind):
        vmem_cap = 48 << 20   # v7x: 64 MiB physical, leave compiler headroom
    else:
        vmem_cap = 96 << 20   # v5e / v6e: 128 MiB physical
    return is_v7, vmem_cap


_IS_V7, _VMEM_CAP = _detect_tpu()


def _choose_tile(size, max_tile, align):
    """Pick a tile for an axis of (already align-multiple) extent `size`.

    Prefers a divisor of `size` (=> zero padding). Falls back to padding up
    to a multiple of the max tile only when no reasonable divisor exists.
    Returns (tile, padded_size).
    """
    if size <= max_tile:
        return size, size
    max_t = (max_tile // align) * align
    min_accept = max(align, (max_tile // 4 // align) * align)
    t = max_t
    while t >= min_accept:
        if size % t == 0:
            return t, size
        t -= align
    return max_t, _round_up(size, max_t)


def prepare_linear_params(weight, bias):
    """weight: (N, K) in PyTorch convention, bias: (N,).

    Returns (w_t, b2d): weight transposed to (Kp, Np), cast to bf16 and
    zero-padded to 128-multiples ONCE; bias reshaped/padded to (1, Np) f32.
    """
    N, K = weight.shape
    Kp, Np = _round_up(K, 128), _round_up(N, 128)
    w_t = jnp.zeros((Kp, Np), jnp.bfloat16)
    w_t = w_t.at[:K, :N].set(jnp.asarray(weight).T.astype(jnp.bfloat16))
    b2d = jnp.zeros((1, Np), jnp.float32)
    b2d = b2d.at[0, :N].set(jnp.asarray(bias).astype(jnp.float32))
    return w_t, b2d


def linear_kernel(x_ref, w_ref, b_ref, o_ref, acc_ref):
    # x_ref: (tm, tk) f32, w_ref: (tk, tn) bf16, b_ref: (1, tn) f32,
    # o_ref: (tm, tn), acc_ref: (tm, tn) f32 scratch resident across K.
    k = pl.program_id(2)

    @pl.when(k == 0)
    def _():
        acc_ref[...] = jnp.zeros_like(acc_ref)

    # bf16 x bf16 MXU matmul, f32 accumulation.
    acc_ref[...] += jnp.dot(
        x_ref[...].astype(jnp.bfloat16),
        w_ref[...],
        preferred_element_type=jnp.float32,
    )

    @pl.when(k == pl.num_programs(2) - 1)
    def _():
        # f32 epilogue (bias add + cast) — safe on v5e (no bf16 VPU).
        o_ref[...] = (acc_ref[...] + b_ref[...]).astype(o_ref.dtype)


@functools.partial(jax.jit, static_argnames=("n_out",))
def linear_pallas(x, w_t, b2d, *, n_out):
    """x: (B, K); w_t: (Kp, Np) bf16 pre-padded; b2d: (1, Np) f32. -> (B, n_out)."""
    B, K = x.shape
    Kp, Np = w_t.shape
    assert K <= Kp and b2d.shape == (1, Np) and n_out <= Np

    # Tile choice: prefer exact divisors of the aligned extents (no padding).
    tm, Bp = _choose_tile(_round_up(B, 8), 512, 8)
    tk, Kp2 = _choose_tile(Kp, 2048, 128)
    tn, Np2 = _choose_tile(Np, 1024, 128)

    # Rare fallback: extra padding beyond the init-time 128 alignment.
    if Kp2 != Kp or Np2 != Np:
        w_t = jnp.pad(w_t, ((0, Kp2 - Kp), (0, Np2 - Np)))
        b2d = jnp.pad(b2d, ((0, 0), (0, Np2 - Np)))
        Kp, Np = Kp2, Np2

    # v7x megacore: make sure at least one parallel grid axis has >= 2 blocks.
    if _IS_V7 and (Bp // tm) == 1 and (Np // tn) == 1:
        if tn % 256 == 0:
            tn //= 2
        elif tm % 16 == 0:
            tm //= 2

    # Pad only x (the cheap tensor); zero K-padding is reduction-safe.
    if (Bp, Kp) != (B, K):
        x = jnp.pad(x, ((0, Bp - B), (0, Kp - K)))

    grid = (Bp // tm, Np // tn, Kp // tk)
    gm, gn, gk = grid

    x_item = jnp.dtype(x.dtype).itemsize
    w_item = jnp.dtype(w_t.dtype).itemsize
    # Double-buffered x/w/bias tiles + f32 accumulator + double-buffered out.
    vmem_needed = (
        2 * tm * tk * x_item
        + 2 * tk * tn * w_item
        + 2 * tn * 4
        + tm * tn * 4
        + 2 * tm * tn * x_item
    )
    vmem_limit = int(min(max(int(vmem_needed * 1.5), 16 << 20), _VMEM_CAP))

    cost = pl.CostEstimate(
        flops=2 * B * K * n_out,
        transcendentals=0,
        bytes_accessed=(
            Bp * Kp * x_item * gn      # x re-streamed once per N block
            + Kp * Np * w_item * gm    # w re-streamed once per M block
            + Np * 4
            + Bp * Np * x_item
        ),
    )

    out = pl.pallas_call(
        linear_kernel,
        out_shape=jax.ShapeDtypeStruct((Bp, Np), x.dtype),
        grid_spec=pltpu.PrefetchScalarGridSpec(
            num_scalar_prefetch=0,
            grid=grid,
            in_specs=[
                pl.BlockSpec((tm, tk), lambda i, j, k: (i, k)),
                # TODO(synk): sweep pipeline_mode=pl.Buffered(3) on this spec
                # if a profile shows exposed weight DMA between K steps.
                pl.BlockSpec((tk, tn), lambda i, j, k: (k, j)),
                pl.BlockSpec((1, tn), lambda i, j, k: (0, j)),
            ],
            out_specs=pl.BlockSpec((tm, tn), lambda i, j, k: (i, j)),
            scratch_shapes=[pltpu.VMEM((tm, tn), jnp.float32)],
        ),
        compiler_params=pltpu.CompilerParams(
            dimension_semantics=("parallel", "parallel", "arbitrary"),
            vmem_limit_bytes=vmem_limit,
        ),
        cost_estimate=cost,
    )(x, w_t, b2d)

    if (Bp, Np) != (B, n_out):
        out = out[:B, :n_out]
    return out


class Model:
    """JAX mirror of the PyTorch Model (nn.Linear forward)."""

    def __init__(self, input_size, output_size, key):
        kw, kb = jax.random.split(key)
        bound = 1.0 / (input_size ** 0.5)
        # PyTorch convention: W is (out, in), b is (out,). Keep f32 masters.
        self.weight = jax.random.uniform(
            kw, (output_size, input_size), jnp.float32, -bound, bound)
        self.bias = jax.random.uniform(
            kb, (output_size,), jnp.float32, -bound, bound)
        self.output_size = output_size
        # Transpose + cast to bf16 + pad to 128-multiples ONCE — nothing big
        # is rewritten in HBM per call.
        self.weight_t, self.bias2d = prepare_linear_params(self.weight, self.bias)

    def forward(self, x):
        out = linear_pallas(x, self.weight_t, self.bias2d,
                            n_out=self.output_size)
        print('\tIn Model: input size', tuple(x.shape),
              'output size', tuple(out.shape))
        return out


if __name__ == "__main__":
    key = jax.random.PRNGKey(0)
    k_model, k_x = jax.random.split(key)

    batch, input_size, output_size = 8, 32, 16
    model = Model(input_size, output_size, k_model)
    x = jax.random.normal(k_x, (batch, input_size), jnp.float32)

    out = model.forward(x)
    out = jax.block_until_ready(out)
    assert out.shape == (batch, output_size)

    # Correctness check vs. a reference that uses the same bf16-rounded
    # operands with f32 accumulation (matches the kernel's numerics).
    x_bf = x.astype(jnp.bfloat16).astype(jnp.float32)
    w_bf = model.weight.astype(jnp.bfloat16).astype(jnp.float32)
    ref = jnp.dot(x_bf, w_bf.T, precision=jax.lax.Precision.HIGHEST) + model.bias
    assert jnp.allclose(out, ref, atol=2e-2, rtol=2e-2)

    # Larger, tile-spanning shape to exercise the K pipeline / divisor tiling.
    B2, K2, N2 = 384, 1024, 640
    kx2, kw2, kb2 = jax.random.split(jax.random.PRNGKey(1), 3)
    x2 = jax.random.normal(kx2, (B2, K2), jnp.float32)
    w2 = jax.random.normal(kw2, (N2, K2), jnp.float32) * 0.02
    b2 = jax.random.normal(kb2, (N2,), jnp.float32)
    w2_t, b2_2d = prepare_linear_params(w2, b2)
    out2 = jax.block_until_ready(linear_pallas(x2, w2_t, b2_2d, n_out=N2))
    x2_bf = x2.astype(jnp.bfloat16).astype(jnp.float32)
    w2_bf = w2.astype(jnp.bfloat16).astype(jnp.float32)
    ref2 = jnp.dot(x2_bf, w2_bf.T, precision=jax.lax.Precision.HIGHEST) + b2
    assert out2.shape == (B2, N2)
    assert jnp.allclose(out2, ref2, atol=2e-2, rtol=2e-2)

    print("KERNEL_OK")
</pallas_src>

<mosaic_0001>
module attributes {stable_mosaic.version = 11 : i64} {
  func.func @linear_kernel(%arg0: i32, %arg1: i32, %arg2: i32, %arg3: memref<8x128xf32, #tpu.memory_space<vmem>>, %arg4: memref<128x128xbf16, #tpu.memory_space<vmem>>, %arg5: memref<1x128xf32, #tpu.memory_space<vmem>>, %arg6: memref<8x128xf32, #tpu.memory_space<vmem>>, %arg7: memref<8x128xf32, #tpu.memory_space<vmem>>) attributes {dimension_semantics = [#tpu.dimension_semantics<parallel>, #tpu.dimension_semantics<parallel>, #tpu.dimension_semantics<arbitrary>], iteration_bounds = array<i64: 1, 1, 1>, scalar_prefetch = 0 : i64, scratch_operands = 1 : i64, tpu.core_type = #tpu.core_type<tc>, window_params = [{transform_indices = @transform_0, window_bounds = array<i64: 8, 128>}, {transform_indices = @transform_1, window_bounds = array<i64: 128, 128>}, {transform_indices = @transform_2, window_bounds = array<i64: 1, 128>}, {transform_indices = @transform_3, window_bounds = array<i64: 8, 128>}]} {
    %c0_i32 = arith.constant 0 : i32
    %0 = arith.cmpi eq, %arg2, %c0_i32 : i32
    %1 = arith.extui %0 : i1 to i32
    %c0_i32_0 = arith.constant 0 : i32
    %2 = arith.cmpi ne, %1, %c0_i32_0 : i32
    scf.if %2 {
      %cst_10 = arith.constant 0.000000e+00 : f32
      %13 = vector.broadcast %cst_10 : f32 to vector<8x128xf32>
      %c0_11 = arith.constant 0 : index
      %c0_12 = arith.constant 0 : index
      %14 = vector.load %arg7[%c0_11, %c0_12] : memref<8x128xf32, #tpu.memory_space<vmem>>, vector<8x128xf32>
      tpu.vector_store %arg7[%c0_11, %c0_12], %13 {strides = array<i32>} : memref<8x128xf32, #tpu.memory_space<vmem>>, vector<8x128xf32>,
    } else {
    }
    %c0 = arith.constant 0 : index
    %c0_1 = arith.constant 0 : index
    %3 = vector.load %arg7[%c0, %c0_1] : memref<8x128xf32, #tpu.memory_space<vmem>>, vector<8x128xf32>
    %c0_2 = arith.constant 0 : index
    %c0_3 = arith.constant 0 : index
    %4 = vector.load %arg3[%c0_2, %c0_3] : memref<8x128xf32, #tpu.memory_space<vmem>>, vector<8x128xf32>
    %5 = arith.truncf %4 : vector<8x128xf32> to vector<8x128xbf16>
    %c0_4 = arith.constant 0 : index
    %c0_5 = arith.constant 0 : index
    %6 = vector.load %arg4[%c0_4, %c0_5] : memref<128x128xbf16, #tpu.memory_space<vmem>>, vector<128x128xbf16>
    %cst = arith.constant dense<0.000000e+00> : vector<8x128xf32>
    %7 = tpu.matmul %5, %6, %cst {dimension_numbers = #tpu.dot_dimension_numbers<[1], [0], [0], [1], [0, 0, 1, 1], [], []>} : vector<8x128xbf16>, vector<128x128xbf16>, vector<8x128xf32> -> vector<8x128xf32>
    %8 = arith.addf %3, %7 : vector<8x128xf32>
    %c0_6 = arith.constant 0 : index
    %c0_7 = arith.constant 0 : index
    %9 = vector.load %arg7[%c0_6, %c0_7] : memref<8x128xf32, #tpu.memory_space<vmem>>, vector<8x128xf32>
    tpu.vector_store %arg7[%c0_6, %c0_7], %8 {strides = array<i32>} : memref<8x128xf32, #tpu.memory_space<vmem>>, vector<8x128xf32>,
    %c0_i32_8 = arith.constant 0 : i32
    %10 = arith.cmpi eq, %arg2, %c0_i32_8 : i32
    %11 = arith.extui %10 : i1 to i32
    %c0_i32_9 = arith.constant 0 : i32
    %12 = arith.cmpi ne, %11, %c0_i32_9 : i32
    scf.if %12 {
      %c0_10 = arith.constant 0 : index
      %c0_11 = arith.constant 0 : index
      %13 = vector.load %arg7[%c0_10, %c0_11] : memref<8x128xf32, #tpu.memory_space<vmem>>, vector<8x128xf32>
      %c0_12 = arith.constant 0 : index
      %c0_13 = arith.constant 0 : index
      %14 = vector.load %arg5[%c0_12, %c0_13] : memref<1x128xf32, #tpu.memory_space<vmem>>, vector<1x128xf32>
      %15 = vector.broadcast %14 : vector<1x128xf32> to vector<8x128xf32>
      %16 = arith.addf %13, %15 : vector<8x128xf32>
      %c0_14 = arith.constant 0 : index
      %c0_15 = arith.constant 0 : index
      %17 = vector.load %arg6[%c0_14, %c0_15] : memref<8x128xf32, #tpu.memory_space<vmem>>, vector<8x128xf32>
      tpu.vector_store %arg6[%c0_14, %c0_15], %16 {strides = array<i32>} : memref<8x128xf32, #tpu.memory_space<vmem>>, vector<8x128xf32>,
    } else {
    }
    return
  }
  func.func @transform_0(%arg0: i32, %arg1: i32, %arg2: i32) -> (i32, i32) {
    %c0_i32 = arith.constant 0 : i32
    return %arg0, %arg2 : i32, i32
  }
  func.func @transform_1(%arg0: i32, %arg1: i32, %arg2: i32) -> (i32, i32) {
    %c0_i32 = arith.constant 0 : i32
    return %arg2, %arg1 : i32, i32
  }
  func.func @transform_2(%arg0: i32, %arg1: i32, %arg2: i32) -> (i32, i32) {
    %c0_i32 = arith.constant 0 : i32
    %c0_i32_0 = arith.constant 0 : i32
    return %c0_i32, %arg1 : i32, i32
  }
  func.func @transform_3(%arg0: i32, %arg1: i32, %arg2: i32) -> (i32, i32) {
    %c0_i32 = arith.constant 0 : i32
    return %arg0, %arg1 : i32, i32
  }
}

</mosaic_0001>

<bundles_post_ra>
// kernel: linear_pallas.1
= control target key start
LH: loop header
LB: loop body
LE: loop exit
PB: predicated region body
PF: predicated region fallthrough
CT: control target
= control target key end

     0   :  { %8 = vsyncpa [#allocation4], 0  ;;  %s328_s0 = inlined_call_operand.vmem [shape: f32[8,128], index: 0, kind: input, shape index: {}]   ;;  %s329_s1 = inlined_call_operand.hbm [shape: bf16[128,128], index: 1, kind: input, shape index: {}]   ;;  %s330_s2 = inlined_call_operand.vmem [shape: f32[1,128], index: 2, kind: input, shape index: {}]   ;;  %s331_s3 = inlined_call_operand.hbm [shape: f32[8,128], index: 3, kind: output, shape index: {}]  }
   0x1   :  { %9 = vsyncpa [#allocation5], 0  ;;  %s272_s12 = smov [#allocation3]   ;;  %s224_s16 = scalar_lea.hbm %s329_s1, 1024 }
   0x2   :  { %s17_s13 = sshll.u32 %s272_s12, 4  ;;  %p225_p0 = scmp.ne.s32.totalorder %s329_s1, %s224_s16  ;;  %s18_s13 = int_to_ptr.vmem [resolvable:$true] %s17_s13 }
   0x3   :  { %p228_p1 = scmp.lt.u32.totalorder %s224_s16, %s329_s1 }
   0x5   :  { %p230_p2 = pnand %p228_p1, %p225_p0 }
   0x7   :  { %233 = shalt.err (!%p230_p2)
}
   0x8   :  { %s234_s21 = scalar_lea.vmem %s18_s13, 1024  ;;  %p239_p4 = scmp.lt.s32.totalorder %s18_s13, %s18_s13 }
   0x9   :  { %p235_p3 = scmp.ne.s32.totalorder %s18_s13, %s234_s21  ;;  %p240_p5 = scmp.lt.s32.totalorder %s234_s21, %s234_s21 }
   0xb   :  { %p241_p6 = por %p240_p5, %p239_p4 }
   0xd   :  { %p242_p7 = pnand %p241_p6, %p235_p3 }
   0xf   :  { %245 = shalt.err (!%p242_p7)
}
  0x10   :  { %s273_s22 = smov 64   ;;  %s274_s23 = smov 4  }
  0x11   :  { %23 = dma.hbm_to_vmem [thread:$0]  %s329_s1, 1024, %s18_s13, [#allocation4], %s273_s22, %s273_s22, %s274_s23  }
  0x12   :  { %268 = dma.done.wait [#allocation4], 1024  }
  0x13   :  { %269 = vsyncadd [#allocation4], 4294966272  ;;  %v275_v0 = vmov 0.0   ;;  %vm276_vm0 = vmmov 0   ;;  %v216_v1 = vld [vmem:[#allocation3] sm:$0xff]   ;;  %v217_v2 = vld [vmem:[#allocation3 + $0x8] sm:$0xff]  }
  0x14   :  { %190 = vmatprep.subr.bf16.mxu0 %v275_v0  ;;  %206 = vmatprep.mubr.msk.bf16.mxu0 %vm276_vm0, %v275_v0  ;;  %v218_v3 = vld [vmem:[#allocation3 + $0x10] sm:$0xff]   ;;  %v219_v4 = vld [vmem:[#allocation3 + $0x18] sm:$0xff]   ;;  %v220_v5 = vld [vmem:[#allocation3 + $0x20] sm:$0xff]   ;;  %s277_s29 = smov [#allocation6]  }
  0x15   :  { %191 = vmatpush3.bf16.msra.mxu0 %v216_v1  ;;  %v221_v6 = vld [vmem:[#allocation3 + $0x28] sm:$0xff]   ;;  %v222_v7 = vld [vmem:[#allocation3 + $0x30] sm:$0xff]   ;;  %v223_v8 = vld [vmem:[#allocation3 + $0x38] sm:$0xff]   ;;  %s163_s30 = sshll.u32 %s277_s29, 4  ;;  %s164_s30 = int_to_ptr.vmem [resolvable:$true] %s163_s30 }
  0x16   :  { %192 = vmatprep.subr.bf16.mxu0 %v275_v0  ;;  %v36_v9 = vld [vmem:[%s328_s0] sm:$0xff]  ;;  %s246_s4 = scalar_lea.vmem %s164_s30, 128  ;;  %p251_p9 = scmp.lt.s32.totalorder %s164_s30, %s164_s30 }
  0x17   :  { %v37_v10 = vpack.c.bf16 %v36_v9, %v36_v9  ;;  %v180_v11 = vld [vmem:[%s330_s2] ss:$0 sm:$0xff]  ;;  %p247_p8 = scmp.ne.s32.totalorder %s164_s30, %s246_s4  ;;  %p252_p10 = scmp.lt.s32.totalorder %s246_s4, %s246_s4 }
  0x19   :  { %193 = vmatpush3.bf16.msra.mxu0 %v217_v2  ;;  %p253_p11 = por %p252_p10, %p251_p9 }
  0x1a   :  { %194 = vmatprep.subr.bf16.mxu0 %v275_v0 }
  0x1b   :  { %p254_p12 = pnand %p253_p11, %p247_p8 }
  0x1d   :  { %195 = vmatpush3.bf16.msra.mxu0 %v218_v3 }
  0x1e   :  { %196 = vmatprep.subr.bf16.mxu0 %v275_v0 }
  0x21   :  { %197 = vmatpush3.bf16.msra.mxu0 %v219_v4 }
  0x22   :  { %198 = vmatprep.subr.bf16.mxu0 %v275_v0 }
  0x25   :  { %199 = vmatpush3.bf16.msra.mxu0 %v220_v5 }
  0x26   :  { %200 = vmatprep.subr.bf16.mxu0 %v275_v0 }
  0x29   :  { %201 = vmatpush3.bf16.msra.mxu0 %v221_v6 }
  0x2a   :  { %202 = vmatprep.subr.bf16.mxu0 %v275_v0 }
  0x2d   :  { %203 = vmatpush3.bf16.msra.mxu0 %v222_v7 }
  0x2e   :  { %204 = vmatprep.subr.bf16.mxu0 %v275_v0 }
  0x31   :  { %205 = vmatpush3.bf16.msra.mxu0 %v223_v8 }
  0x34   :  { %207 = vmatmul.mubr.bf16.vlgmr.msra.gmra.mrb[0].mxu0 %v37_v10 }
 0x107   :  { %v136_v12 = vpop.f32.mrb[0].mxu0 }
 0x108   :  { %v155_v13 = vadd.f32 %v180_v11, %v136_v12  ;;  %v208_v14 = vpop.f32.mrb[1].mxu0 }
 0x109   :  { %v139_v15 = vpop.f32.mrb[2].mxu0 }
 0x10a   :  { %156 = vst [vmem:[#allocation6] sm:$0xff] %v155_v13  ;;  %v209_v16 = vpop.f32.mrb[3].mxu0 }
 0x10b   :  { %257 = shalt.err (!%p254_p12)
}
 0x10c   :  { %s258_s2 = scalar_lea.hbm %s331_s3, 128 }
 0x10d   :  { %p259_p13 = scmp.ne.s32.totalorder %s331_s3, %s258_s2  ;;  %p262_p0 = scmp.lt.u32.totalorder %s258_s2, %s331_s3 }
 0x10f   :  { %p264_p1 = pnand %p262_p0, %p259_p13 }
 0x111   :  { %267 = shalt.err (!%p264_p1)
}
 0x112   :  { %166 = dma.vmem_to_hbm [thread:$0]  %s164_s30, 128, %s331_s3, [#allocation5]  }
 0x113   :  { %270 = dma.done.wait [#allocation5], 128  }
 0x114   :  { %271 = vsyncadd [#allocation5], 4294967168 }
 0x115   :  { %170 = vsyncpa [#allocation4], 1 }
 0x116   :  { %171 = vsyncpa [#allocation5], 1 }

</bundles_post_ra>
